<compile_context>
chip_gen: v6e
topology: v6e:2x2x1
jax: 0.10.0
libtpu: 0.0.40
codegen_flags: <defaults>
</compile_context>

<pallas_src>
import functools

import jax
import jax.numpy as jnp
from jax.experimental import pallas as pl
from jax.experimental.pallas import tpu as pltpu


def gru_kernel(x_ref, wi_ref, wh_ref, bi_ref, bhn_ref, out_ref):
    """Single-layer GRU (batch=1), PyTorch gate conventions [r, z, n].

    x_ref   : (T, I)     f32
    wi_ref  : (I, Gpad)  f32   fused [Wir|Wiz|Win], zero-padded to Gpad lanes
    wh_ref  : (H, Gpad)  bf16  fused [Whr|Whz|Whn], zero-padded
    bi_ref  : (1, Gpad)  f32   fused [bir+bhr | biz+bhz | bin], zero-padded
    bhn_ref : (1, H)     f32
    out_ref : (T, H)     f32
    """
    T, H = out_ref.shape

    # One fused f32 MXU pass for ALL timesteps and all three gates; recurrent
    # biases for r/z are already folded into bi.  Kept as a traced value (the
    # whole (T, Gpad) block is ~2 vregs), no VMEM scratch round trip.
    gi = jnp.dot(x_ref[...], wi_ref[...],
                 preferred_element_type=jnp.float32) + bi_ref[...]

    wh = wh_ref[...]                       # (H, Gpad) bf16, resident in vregs
    bhn = bhn_ref[...]                     # (1, H) f32

    # ---- peeled step 0: h == 0, so the recurrent matmul is dead code ----
    gi0 = gi[0:1, :]
    rz0 = jax.nn.sigmoid(gi0[:, :2 * H])            # fused r/z sigmoid
    n0 = jnp.tanh(gi0[:, 2 * H:3 * H] + rz0[:, :H] * bhn)
    h = n0 - rz0[:, H:2 * H] * n0                   # (1 - z0) * n0
    out_ref[pl.ds(0, 1), :] = h

    # ---- steps 1..T-1 fully unrolled; h carried purely in vregs ----
    for t in range(1, T):
        # Single bf16 (1,H)@(H,Gpad) MXU pass for all three recurrent gates;
        # accumulate in f32, all elementwise math stays f32.
        gh = jnp.dot(h.astype(jnp.bfloat16), wh,
                     preferred_element_type=jnp.float32)        # (1, Gpad)
        gi_t = gi[t:t + 1, :]                                   # static slice
        rz = jax.nn.sigmoid(gi_t[:, :2 * H] + gh[:, :2 * H])    # one EUP push
        r = rz[:, :H]
        z = rz[:, H:2 * H]
        n = jnp.tanh(gi_t[:, 2 * H:3 * H] + r * (gh[:, 2 * H:3 * H] + bhn))
        h = n + z * (h - n)                 # == (1 - z) * n + z * h
        out_ref[pl.ds(t, 1), :] = h         # only VMEM store in the loop


def gru_forward(x_seq, packed):
    T, I = x_seq.shape
    H = packed["bhn"].shape[1]
    G = packed["wi"].shape[1]              # padded fused gate width (>= 3H)
    vmem = pl.BlockSpec(memory_space=pltpu.MemorySpace.VMEM)
    cost = pl.CostEstimate(
        flops=2 * T * I * 3 * H + 2 * (T - 1) * H * 3 * H + 12 * T * H,
        transcendentals=3 * T * H,
        bytes_accessed=4 * (T * I + I * G + G + H + T * H) + 2 * H * G,
    )
    return pl.pallas_call(
        gru_kernel,
        out_shape=jax.ShapeDtypeStruct((T, H), jnp.float32),
        in_specs=[vmem] * 5,
        out_specs=vmem,
        cost_estimate=cost,
    )(x_seq, packed["wi"], packed["wh"], packed["bi"], packed["bhn"])


@functools.partial(jax.jit,
                   static_argnames=("largest_w", "largest_h", "out0", "out1"))
def gru_t7_forward(x, packed, *, largest_w, largest_h, out0, out1):
    """pad + flatten + GRU + reshape, fused under one jit (dispatch amortized)."""
    ch, iw, ih = x.shape
    # TODO(synk): pad_crop is not defined in the reference; assumed
    # zero-padding on the trailing edge of each spatial dim (goal='pad').
    x = jnp.pad(x, ((0, 0), (0, largest_w - iw), (0, largest_h - ih)))
    x_seq = x.reshape(ch, -1).astype(jnp.float32)        # (ch, W*H), batch=1
    h_seq = gru_forward(x_seq, packed)                   # (ch, H)
    # Attention branch of the reference is a data no-op (Attention.forward
    # returns its input unchanged); the reshape round-trip preserves layout.
    return h_seq.reshape(1, ch, out0, out1)


class GRUT7Pallas:
    """JAX/Pallas port of GRU_T7."""

    def __init__(self, out_dim, largest_w, largest_h, attention, key):
        self.largest_w = largest_w
        self.largest_h = largest_h
        self.out_dim = tuple(out_dim)
        self.attention_value = attention
        input_size = largest_w * largest_h
        hidden = out_dim[0] * out_dim[1]
        bound = 1.0 / float(hidden) ** 0.5
        keys = jax.random.split(key, 12)

        def u(k, shape):
            return jax.random.uniform(k, shape, jnp.float32, -bound, bound)

        # PyTorch stores weight_ih_l0 as (3H, I) with gates [r, z, n]; we keep
        # split, transposed copies for the reference check.
        self.params = {
            "wir": u(keys[0], (input_size, hidden)),
            "wiz": u(keys[1], (input_size, hidden)),
            "win": u(keys[2], (input_size, hidden)),
            "whr": u(keys[3], (hidden, hidden)),
            "whz": u(keys[4], (hidden, hidden)),
            "whn": u(keys[5], (hidden, hidden)),
            "bir": u(keys[6], (1, hidden)),
            "biz": u(keys[7], (1, hidden)),
            "bin": u(keys[8], (1, hidden)),
            "bhr": u(keys[9], (1, hidden)),
            "bhz": u(keys[10], (1, hidden)),
            "bhn": u(keys[11], (1, hidden)),
        }

        # Pack for the kernel: fuse gates along lanes, fold r/z recurrent
        # biases into the input biases, zero-pad 3H to a 128-lane multiple so
        # gate matmuls are lane-dense and unmasked.  wh is pre-cast to bf16
        # once here so the per-step recurrent dot is a single MXU pass.
        p = self.params
        G = 3 * hidden
        Gpad = ((G + 127) // 128) * 128
        pad = Gpad - G
        wi = jnp.concatenate([p["wir"], p["wiz"], p["win"]], axis=1)
        wh = jnp.concatenate([p["whr"], p["whz"], p["whn"]], axis=1)
        bi = jnp.concatenate(
            [p["bir"] + p["bhr"], p["biz"] + p["bhz"], p["bin"]], axis=1)
        self.packed = {
            "wi": jnp.pad(wi, ((0, 0), (0, pad))),
            "wh": jnp.pad(wh, ((0, 0), (0, pad))).astype(jnp.bfloat16),
            "bi": jnp.pad(bi, ((0, 0), (0, pad))),
            "bhn": p["bhn"],
        }
        # The reference also builds Attention(10, 10) linear layers, but its
        # forward returns its input unchanged, so they never affect the output.

    def __call__(self, x):
        return gru_t7_forward(
            x, self.packed,
            largest_w=self.largest_w, largest_h=self.largest_h,
            out0=self.out_dim[0], out1=self.out_dim[1])


def gru_ref(x_seq, p, recurrent_bf16=False):
    """Pure-JAX reference of the PyTorch nn.GRU recurrence (batch=1).

    recurrent_bf16=True mirrors the kernel's bf16 recurrent-dot operands so a
    tight tolerance can be used; False is the full-f32 PyTorch semantics.
    """
    T = x_seq.shape[0]
    H = p["whr"].shape[0]
    whr, whz, whn = p["whr"], p["whz"], p["whn"]
    if recurrent_bf16:
        whr, whz, whn = (w.astype(jnp.bfloat16) for w in (whr, whz, whn))
    h = jnp.zeros((H,), jnp.float32)
    outs = []
    for t in range(T):
        xt = x_seq[t]
        hh = h.astype(jnp.bfloat16) if recurrent_bf16 else h
        ghr = jnp.dot(hh, whr, preferred_element_type=jnp.float32)
        ghz = jnp.dot(hh, whz, preferred_element_type=jnp.float32)
        ghn = jnp.dot(hh, whn, preferred_element_type=jnp.float32)
        r = jax.nn.sigmoid(xt @ p["wir"] + p["bir"][0] + ghr + p["bhr"][0])
        z = jax.nn.sigmoid(xt @ p["wiz"] + p["biz"][0] + ghz + p["bhz"][0])
        n = jnp.tanh(xt @ p["win"] + p["bin"][0] + r * (ghn + p["bhn"][0]))
        h = (1.0 - z) * n + z * h
        outs.append(h)
    return jnp.stack(outs)


if __name__ == "__main__":
    key = jax.random.PRNGKey(0)
    k_param, k_x = jax.random.split(key)

    largest_w, largest_h = 8, 8          # GRU input_size = 64
    out_dim = (4, 8)                     # GRU hidden_size = 32
    model = GRUT7Pallas(out_dim, largest_w, largest_h, attention=1.0,
                        key=k_param)

    # ARC-style input: 10 channels, small spatial grid (gets padded to 8x8).
    x = jax.random.uniform(k_x, (10, 6, 7), jnp.float32)

    y = model(x)
    jax.block_until_ready(y)
    assert y.shape == (1, 10, out_dim[0], out_dim[1]), y.shape

    # Numerical checks of the Pallas GRU:
    #  1) against a reference that mirrors the kernel's bf16 recurrent dot
    #     (tight tolerance), and
    #  2) against the full-f32 PyTorch-semantics reference (looser tolerance
    #     that accounts only for the bf16 recurrent-dot operands).
    x_seq = jnp.pad(x, ((0, 0), (0, 2), (0, 1))).reshape(10, -1)
    shp = (1, 10, out_dim[0], out_dim[1])
    ref_bf16 = gru_ref(x_seq, model.params, recurrent_bf16=True).reshape(shp)
    ref_f32 = gru_ref(x_seq, model.params, recurrent_bf16=False).reshape(shp)
    err_matched = float(jnp.max(jnp.abs(y - ref_bf16)))
    err_f32 = float(jnp.max(jnp.abs(y - ref_f32)))
    assert err_matched < 1e-3, f"matched-precision max abs err {err_matched}"
    assert err_f32 < 2e-2, f"f32-reference max abs err {err_f32}"

    print("KERNEL_OK")
</pallas_src>

<mosaic_0001>
module attributes {stable_mosaic.version = 11 : i64} {
  func.func @gru_kernel(%arg0: memref<10x64xf32, #tpu.memory_space<vmem>>, %arg1: memref<64x128xf32, #tpu.memory_space<vmem>>, %arg2: memref<32x128xbf16, #tpu.memory_space<vmem>>, %arg3: memref<1x128xf32, #tpu.memory_space<vmem>>, %arg4: memref<1x32xf32, #tpu.memory_space<vmem>>, %arg5: memref<10x32xf32, #tpu.memory_space<vmem>>) attributes {dimension_semantics = [], scalar_prefetch = 0 : i64, scratch_operands = 0 : i64, tpu.core_type = #tpu.core_type<tc>} {
    %c0 = arith.constant 0 : index
    %c0_0 = arith.constant 0 : index
    %0 = vector.load %arg0[%c0, %c0_0] : memref<10x64xf32, #tpu.memory_space<vmem>>, vector<10x64xf32>
    %c0_1 = arith.constant 0 : index
    %c0_2 = arith.constant 0 : index
    %1 = vector.load %arg1[%c0_1, %c0_2] : memref<64x128xf32, #tpu.memory_space<vmem>>, vector<64x128xf32>
    %cst = arith.constant dense<0.000000e+00> : vector<10x128xf32>
    %2 = tpu.matmul %0, %1, %cst {dimension_numbers = #tpu.dot_dimension_numbers<[1], [0], [0], [1], [0, 0, 1, 1], [], []>} : vector<10x64xf32>, vector<64x128xf32>, vector<10x128xf32> -> vector<10x128xf32>
    %c0_3 = arith.constant 0 : index
    %c0_4 = arith.constant 0 : index
    %3 = vector.load %arg3[%c0_3, %c0_4] : memref<1x128xf32, #tpu.memory_space<vmem>>, vector<1x128xf32>
    %4 = vector.broadcast %3 : vector<1x128xf32> to vector<10x128xf32>
    %5 = arith.addf %2, %4 : vector<10x128xf32>
    %c0_5 = arith.constant 0 : index
    %c0_6 = arith.constant 0 : index
    %6 = vector.load %arg2[%c0_5, %c0_6] : memref<32x128xbf16, #tpu.memory_space<vmem>>, vector<32x128xbf16>
    %c0_7 = arith.constant 0 : index
    %c0_8 = arith.constant 0 : index
    %7 = vector.load %arg4[%c0_7, %c0_8] : memref<1x32xf32, #tpu.memory_space<vmem>>, vector<1x32xf32>
    %8 = vector.extract_strided_slice %5 {offsets = [0, 0], sizes = [1, 128], strides = [1, 1]} : vector<10x128xf32> to vector<1x128xf32>
    %9 = vector.extract_strided_slice %8 {offsets = [0, 0], sizes = [1, 64], strides = [1, 1]} : vector<1x128xf32> to vector<1x64xf32>
    %10 = arith.negf %9 : vector<1x64xf32>
    %11 = math.exp %10 : vector<1x64xf32>
    %cst_9 = arith.constant 1.000000e+00 : f32
    %12 = vector.broadcast %cst_9 : f32 to vector<1x64xf32>
    %13 = arith.addf %12, %11 : vector<1x64xf32>
    %14 = arith.divf %12, %13 : vector<1x64xf32>
    %15 = vector.extract_strided_slice %8 {offsets = [0, 64], sizes = [1, 32], strides = [1, 1]} : vector<1x128xf32> to vector<1x32xf32>
    %16 = vector.extract_strided_slice %14 {offsets = [0, 0], sizes = [1, 32], strides = [1, 1]} : vector<1x64xf32> to vector<1x32xf32>
    %17 = arith.mulf %16, %7 : vector<1x32xf32>
    %18 = arith.addf %15, %17 : vector<1x32xf32>
    %19 = math.tanh %18 : vector<1x32xf32>
    %20 = vector.extract_strided_slice %14 {offsets = [0, 32], sizes = [1, 32], strides = [1, 1]} : vector<1x64xf32> to vector<1x32xf32>
    %21 = arith.mulf %20, %19 : vector<1x32xf32>
    %22 = arith.subf %19, %21 : vector<1x32xf32>
    %c0_10 = arith.constant 0 : index
    %c0_11 = arith.constant 0 : index
    %23 = vector.load %arg5[%c0_10, %c0_11] : memref<10x32xf32, #tpu.memory_space<vmem>>, vector<1x32xf32>
    tpu.vector_store %arg5[%c0_10, %c0_11], %22 {strides = array<i32>} : memref<10x32xf32, #tpu.memory_space<vmem>>, vector<1x32xf32>,
    %24 = arith.truncf %22 : vector<1x32xf32> to vector<1x32xbf16>
    %cst_12 = arith.constant dense<0.000000e+00> : vector<1x128xf32>
    %25 = tpu.matmul %24, %6, %cst_12 {dimension_numbers = #tpu.dot_dimension_numbers<[1], [0], [0], [1], [0, 0, 1, 1], [], []>} : vector<1x32xbf16>, vector<32x128xbf16>, vector<1x128xf32> -> vector<1x128xf32>
    %26 = vector.extract_strided_slice %5 {offsets = [1, 0], sizes = [1, 128], strides = [1, 1]} : vector<10x128xf32> to vector<1x128xf32>
    %27 = vector.extract_strided_slice %26 {offsets = [0, 0], sizes = [1, 64], strides = [1, 1]} : vector<1x128xf32> to vector<1x64xf32>
    %28 = vector.extract_strided_slice %25 {offsets = [0, 0], sizes = [1, 64], strides = [1, 1]} : vector<1x128xf32> to vector<1x64xf32>
    %29 = arith.addf %27, %28 : vector<1x64xf32>
    %30 = arith.negf %29 : vector<1x64xf32>
    %31 = math.exp %30 : vector<1x64xf32>
    %cst_13 = arith.constant 1.000000e+00 : f32
    %32 = vector.broadcast %cst_13 : f32 to vector<1x64xf32>
    %33 = arith.addf %32, %31 : vector<1x64xf32>
    %34 = arith.divf %32, %33 : vector<1x64xf32>
    %35 = vector.extract_strided_slice %34 {offsets = [0, 0], sizes = [1, 32], strides = [1, 1]} : vector<1x64xf32> to vector<1x32xf32>
    %36 = vector.extract_strided_slice %34 {offsets = [0, 32], sizes = [1, 32], strides = [1, 1]} : vector<1x64xf32> to vector<1x32xf32>
    %37 = vector.extract_strided_slice %26 {offsets = [0, 64], sizes = [1, 32], strides = [1, 1]} : vector<1x128xf32> to vector<1x32xf32>
    %38 = vector.extract_strided_slice %25 {offsets = [0, 64], sizes = [1, 32], strides = [1, 1]} : vector<1x128xf32> to vector<1x32xf32>
    %39 = arith.addf %38, %7 : vector<1x32xf32>
    %40 = arith.mulf %35, %39 : vector<1x32xf32>
    %41 = arith.addf %37, %40 : vector<1x32xf32>
    %42 = math.tanh %41 : vector<1x32xf32>
    %43 = arith.subf %22, %42 : vector<1x32xf32>
    %44 = arith.mulf %36, %43 : vector<1x32xf32>
    %45 = arith.addf %42, %44 : vector<1x32xf32>
    %c1 = arith.constant 1 : index
    %c0_14 = arith.constant 0 : index
    %46 = vector.load %arg5[%c1, %c0_14] : memref<10x32xf32, #tpu.memory_space<vmem>>, vector<1x32xf32>
    tpu.vector_store %arg5[%c1, %c0_14], %45 {strides = array<i32>} : memref<10x32xf32, #tpu.memory_space<vmem>>, vector<1x32xf32>,
    %47 = arith.truncf %45 : vector<1x32xf32> to vector<1x32xbf16>
    %cst_15 = arith.constant dense<0.000000e+00> : vector<1x128xf32>
    %48 = tpu.matmul %47, %6, %cst_15 {dimension_numbers = #tpu.dot_dimension_numbers<[1], [0], [0], [1], [0, 0, 1, 1], [], []>} : vector<1x32xbf16>, vector<32x128xbf16>, vector<1x128xf32> -> vector<1x128xf32>
    %49 = vector.extract_strided_slice %5 {offsets = [2, 0], sizes = [1, 128], strides = [1, 1]} : vector<10x128xf32> to vector<1x128xf32>
    %50 = vector.extract_strided_slice %49 {offsets = [0, 0], sizes = [1, 64], strides = [1, 1]} : vector<1x128xf32> to vector<1x64xf32>
    %51 = vector.extract_strided_slice %48 {offsets = [0, 0], sizes = [1, 64], strides = [1, 1]} : vector<1x128xf32> to vector<1x64xf32>
    %52 = arith.addf %50, %51 : vector<1x64xf32>
    %53 = arith.negf %52 : vector<1x64xf32>
    %54 = math.exp %53 : vector<1x64xf32>
    %cst_16 = arith.constant 1.000000e+00 : f32
    %55 = vector.broadcast %cst_16 : f32 to vector<1x64xf32>
    %56 = arith.addf %55, %54 : vector<1x64xf32>
    %57 = arith.divf %55, %56 : vector<1x64xf32>
    %58 = vector.extract_strided_slice %57 {offsets = [0, 0], sizes = [1, 32], strides = [1, 1]} : vector<1x64xf32> to vector<1x32xf32>
    %59 = vector.extract_strided_slice %57 {offsets = [0, 32], sizes = [1, 32], strides = [1, 1]} : vector<1x64xf32> to vector<1x32xf32>
    %60 = vector.extract_strided_slice %49 {offsets = [0, 64], sizes = [1, 32], strides = [1, 1]} : vector<1x128xf32> to vector<1x32xf32>
    %61 = vector.extract_strided_slice %48 {offsets = [0, 64], sizes = [1, 32], strides = [1, 1]} : vector<1x128xf32> to vector<1x32xf32>
    %62 = arith.addf %61, %7 : vector<1x32xf32>
    %63 = arith.mulf %58, %62 : vector<1x32xf32>
    %64 = arith.addf %60, %63 : vector<1x32xf32>
    %65 = math.tanh %64 : vector<1x32xf32>
    %66 = arith.subf %45, %65 : vector<1x32xf32>
    %67 = arith.mulf %59, %66 : vector<1x32xf32>
    %68 = arith.addf %65, %67 : vector<1x32xf32>
    %c2 = arith.constant 2 : index
    %c0_17 = arith.constant 0 : index
    %69 = vector.load %arg5[%c2, %c0_17] : memref<10x32xf32, #tpu.memory_space<vmem>>, vector<1x32xf32>
    tpu.vector_store %arg5[%c2, %c0_17], %68 {strides = array<i32>} : memref<10x32xf32, #tpu.memory_space<vmem>>, vector<1x32xf32>,
    %70 = arith.truncf %68 : vector<1x32xf32> to vector<1x32xbf16>
    %cst_18 = arith.constant dense<0.000000e+00> : vector<1x128xf32>
    %71 = tpu.matmul %70, %6, %cst_18 {dimension_numbers = #tpu.dot_dimension_numbers<[1], [0], [0], [1], [0, 0, 1, 1], [], []>} : vector<1x32xbf16>, vector<32x128xbf16>, vector<1x128xf32> -> vector<1x128xf32>
    %72 = vector.extract_strided_slice %5 {offsets = [3, 0], sizes = [1, 128], strides = [1, 1]} : vector<10x128xf32> to vector<1x128xf32>
    %73 = vector.extract_strided_slice %72 {offsets = [0, 0], sizes = [1, 64], strides = [1, 1]} : vector<1x128xf32> to vector<1x64xf32>
    %74 = vector.extract_strided_slice %71 {offsets = [0, 0], sizes = [1, 64], strides = [1, 1]} : vector<1x128xf32> to vector<1x64xf32>
    %75 = arith.addf %73, %74 : vector<1x64xf32>
    %76 = arith.negf %75 : vector<1x64xf32>
    %77 = math.exp %76 : vector<1x64xf32>
    %cst_19 = arith.constant 1.000000e+00 : f32
    %78 = vector.broadcast %cst_19 : f32 to vector<1x64xf32>
    %79 = arith.addf %78, %77 : vector<1x64xf32>
    %80 = arith.divf %78, %79 : vector<1x64xf32>
    %81 = vector.extract_strided_slice %80 {offsets = [0, 0], sizes = [1, 32], strides = [1, 1]} : vector<1x64xf32> to vector<1x32xf32>
    %82 = vector.extract_strided_slice %80 {offsets = [0, 32], sizes = [1, 32], strides = [1, 1]} : vector<1x64xf32> to vector<1x32xf32>
    %83 = vector.extract_strided_slice %72 {offsets = [0, 64], sizes = [1, 32], strides = [1, 1]} : vector<1x128xf32> to vector<1x32xf32>
    %84 = vector.extract_strided_slice %71 {offsets = [0, 64], sizes = [1, 32], strides = [1, 1]} : vector<1x128xf32> to vector<1x32xf32>
    %85 = arith.addf %84, %7 : vector<1x32xf32>
    %86 = arith.mulf %81, %85 : vector<1x32xf32>
    %87 = arith.addf %83, %86 : vector<1x32xf32>
    %88 = math.tanh %87 : vector<1x32xf32>
    %89 = arith.subf %68, %88 : vector<1x32xf32>
    %90 = arith.mulf %82, %89 : vector<1x32xf32>
    %91 = arith.addf %88, %90 : vector<1x32xf32>
    %c3 = arith.constant 3 : index
    %c0_20 = arith.constant 0 : index
    %92 = vector.load %arg5[%c3, %c0_20] : memref<10x32xf32, #tpu.memory_space<vmem>>, vector<1x32xf32>
    tpu.vector_store %arg5[%c3, %c0_20], %91 {strides = array<i32>} : memref<10x32xf32, #tpu.memory_space<vmem>>, vector<1x32xf32>,
    %93 = arith.truncf %91 : vector<1x32xf32> to vector<1x32xbf16>
    %cst_21 = arith.constant dense<0.000000e+00> : vector<1x128xf32>
    %94 = tpu.matmul %93, %6, %cst_21 {dimension_numbers = #tpu.dot_dimension_numbers<[1], [0], [0], [1], [0, 0, 1, 1], [], []>} : vector<1x32xbf16>, vector<32x128xbf16>, vector<1x128xf32> -> vector<1x128xf32>
    %95 = vector.extract_strided_slice %5 {offsets = [4, 0], sizes = [1, 128], strides = [1, 1]} : vector<10x128xf32> to vector<1x128xf32>
    %96 = vector.extract_strided_slice %95 {offsets = [0, 0], sizes = [1, 64], strides = [1, 1]} : vector<1x128xf32> to vector<1x64xf32>
    %97 = vector.extract_strided_slice %94 {offsets = [0, 0], sizes = [1, 64], strides = [1, 1]} : vector<1x128xf32> to vector<1x64xf32>
    %98 = arith.addf %96, %97 : vector<1x64xf32>
    %99 = arith.negf %98 : vector<1x64xf32>
    %100 = math.exp %99 : vector<1x64xf32>
    %cst_22 = arith.constant 1.000000e+00 : f32
    %101 = vector.broadcast %cst_22 : f32 to vector<1x64xf32>
    %102 = arith.addf %101, %100 : vector<1x64xf32>
    %103 = arith.divf %101, %102 : vector<1x64xf32>
    %104 = vector.extract_strided_slice %103 {offsets = [0, 0], sizes = [1, 32], strides = [1, 1]} : vector<1x64xf32> to vector<1x32xf32>
    %105 = vector.extract_strided_slice %103 {offsets = [0, 32], sizes = [1, 32], strides = [1, 1]} : vector<1x64xf32> to vector<1x32xf32>
    %106 = vector.extract_strided_slice %95 {offsets = [0, 64], sizes = [1, 32], strides = [1, 1]} : vector<1x128xf32> to vector<1x32xf32>
    %107 = vector.extract_strided_slice %94 {offsets = [0, 64], sizes = [1, 32], strides = [1, 1]} : vector<1x128xf32> to vector<1x32xf32>
    %108 = arith.addf %107, %7 : vector<1x32xf32>
    %109 = arith.mulf %104, %108 : vector<1x32xf32>
    %110 = arith.addf %106, %109 : vector<1x32xf32>
    %111 = math.tanh %110 : vector<1x32xf32>
    %112 = arith.subf %91, %111 : vector<1x32xf32>
    %113 = arith.mulf %105, %112 : vector<1x32xf32>
    %114 = arith.addf %111, %113 : vector<1x32xf32>
    %c4 = arith.constant 4 : index
    %c0_23 = arith.constant 0 : index
    %115 = vector.load %arg5[%c4, %c0_23] : memref<10x32xf32, #tpu.memory_space<vmem>>, vector<1x32xf32>
    tpu.vector_store %arg5[%c4, %c0_23], %114 {strides = array<i32>} : memref<10x32xf32, #tpu.memory_space<vmem>>, vector<1x32xf32>,
    %116 = arith.truncf %114 : vector<1x32xf32> to vector<1x32xbf16>
    %cst_24 = arith.constant dense<0.000000e+00> : vector<1x128xf32>
    %117 = tpu.matmul %116, %6, %cst_24 {dimension_numbers = #tpu.dot_dimension_numbers<[1], [0], [0], [1], [0, 0, 1, 1], [], []>} : vector<1x32xbf16>, vector<32x128xbf16>, vector<1x128xf32> -> vector<1x128xf32>
    %118 = vector.extract_strided_slice %5 {offsets = [5, 0], sizes = [1, 128], strides = [1, 1]} : vector<10x128xf32> to vector<1x128xf32>
    %119 = vector.extract_strided_slice %118 {offsets = [0, 0], sizes = [1, 64], strides = [1, 1]} : vector<1x128xf32> to vector<1x64xf32>
    %120 = vector.extract_strided_slice %117 {offsets = [0, 0], sizes = [1, 64], strides = [1, 1]} : vector<1x128xf32> to vector<1x64xf32>
    %121 = arith.addf %119, %120 : vector<1x64xf32>
    %122 = arith.negf %121 : vector<1x64xf32>
    %123 = math.exp %122 : vector<1x64xf32>
    %cst_25 = arith.constant 1.000000e+00 : f32
    %124 = vector.broadcast %cst_25 : f32 to vector<1x64xf32>
    %125 = arith.addf %124, %123 : vector<1x64xf32>
    %126 = arith.divf %124, %125 : vector<1x64xf32>
    %127 = vector.extract_strided_slice %126 {offsets = [0, 0], sizes = [1, 32], strides = [1, 1]} : vector<1x64xf32> to vector<1x32xf32>
    %128 = vector.extract_strided_slice %126 {offsets = [0, 32], sizes = [1, 32], strides = [1, 1]} : vector<1x64xf32> to vector<1x32xf32>
    %129 = vector.extract_strided_slice %118 {offsets = [0, 64], sizes = [1, 32], strides = [1, 1]} : vector<1x128xf32> to vector<1x32xf32>
    %130 = vector.extract_strided_slice %117 {offsets = [0, 64], sizes = [1, 32], strides = [1, 1]} : vector<1x128xf32> to vector<1x32xf32>
    %131 = arith.addf %130, %7 : vector<1x32xf32>
    %132 = arith.mulf %127, %131 : vector<1x32xf32>
    %133 = arith.addf %129, %132 : vector<1x32xf32>
    %134 = math.tanh %133 : vector<1x32xf32>
    %135 = arith.subf %114, %134 : vector<1x32xf32>
    %136 = arith.mulf %128, %135 : vector<1x32xf32>
    %137 = arith.addf %134, %136 : vector<1x32xf32>
    %c5 = arith.constant 5 : index
    %c0_26 = arith.constant 0 : index
    %138 = vector.load %arg5[%c5, %c0_26] : memref<10x32xf32, #tpu.memory_space<vmem>>, vector<1x32xf32>
    tpu.vector_store %arg5[%c5, %c0_26], %137 {strides = array<i32>} : memref<10x32xf32, #tpu.memory_space<vmem>>, vector<1x32xf32>,
    %139 = arith.truncf %137 : vector<1x32xf32> to vector<1x32xbf16>
    %cst_27 = arith.constant dense<0.000000e+00> : vector<1x128xf32>
    %140 = tpu.matmul %139, %6, %cst_27 {dimension_numbers = #tpu.dot_dimension_numbers<[1], [0], [0], [1], [0, 0, 1, 1], [], []>} : vector<1x32xbf16>, vector<32x128xbf16>, vector<1x128xf32> -> vector<1x128xf32>
    %141 = vector.extract_strided_slice %5 {offsets = [6, 0], sizes = [1, 128], strides = [1, 1]} : vector<10x128xf32> to vector<1x128xf32>
    %142 = vector.extract_strided_slice %141 {offsets = [0, 0], sizes = [1, 64], strides = [1, 1]} : vector<1x128xf32> to vector<1x64xf32>
    %143 = vector.extract_strided_slice %140 {offsets = [0, 0], sizes = [1, 64], strides = [1, 1]} : vector<1x128xf32> to vector<1x64xf32>
    %144 = arith.addf %142, %143 : vector<1x64xf32>
    %145 = arith.negf %144 : vector<1x64xf32>
    %146 = math.exp %145 : vector<1x64xf32>
    %cst_28 = arith.constant 1.000000e+00 : f32
    %147 = vector.broadcast %cst_28 : f32 to vector<1x64xf32>
    %148 = arith.addf %147, %146 : vector<1x64xf32>
    %149 = arith.divf %147, %148 : vector<1x64xf32>
    %150 = vector.extract_strided_slice %149 {offsets = [0, 0], sizes = [1, 32], strides = [1, 1]} : vector<1x64xf32> to vector<1x32xf32>
    %151 = vector.extract_strided_slice %149 {offsets = [0, 32], sizes = [1, 32], strides = [1, 1]} : vector<1x64xf32> to vector<1x32xf32>
    %152 = vector.extract_strided_slice %141 {offsets = [0, 64], sizes = [1, 32], strides = [1, 1]} : vector<1x128xf32> to vector<1x32xf32>
    %153 = vector.extract_strided_slice %140 {offsets = [0, 64], sizes = [1, 32], strides = [1, 1]} : vector<1x128xf32> to vector<1x32xf32>
    %154 = arith.addf %153, %7 : vector<1x32xf32>
    %155 = arith.mulf %150, %154 : vector<1x32xf32>
    %156 = arith.addf %152, %155 : vector<1x32xf32>
    %157 = math.tanh %156 : vector<1x32xf32>
    %158 = arith.subf %137, %157 : vector<1x32xf32>
    %159 = arith.mulf %151, %158 : vector<1x32xf32>
    %160 = arith.addf %157, %159 : vector<1x32xf32>
    %c6 = arith.constant 6 : index
    %c0_29 = arith.constant 0 : index
    %161 = vector.load %arg5[%c6, %c0_29] : memref<10x32xf32, #tpu.memory_space<vmem>>, vector<1x32xf32>
    tpu.vector_store %arg5[%c6, %c0_29], %160 {strides = array<i32>} : memref<10x32xf32, #tpu.memory_space<vmem>>, vector<1x32xf32>,
    %162 = arith.truncf %160 : vector<1x32xf32> to vector<1x32xbf16>
    %cst_30 = arith.constant dense<0.000000e+00> : vector<1x128xf32>
    %163 = tpu.matmul %162, %6, %cst_30 {dimension_numbers = #tpu.dot_dimension_numbers<[1], [0], [0], [1], [0, 0, 1, 1], [], []>} : vector<1x32xbf16>, vector<32x128xbf16>, vector<1x128xf32> -> vector<1x128xf32>
    %164 = vector.extract_strided_slice %5 {offsets = [7, 0], sizes = [1, 128], strides = [1, 1]} : vector<10x128xf32> to vector<1x128xf32>
    %165 = vector.extract_strided_slice %164 {offsets = [0, 0], sizes = [1, 64], strides = [1, 1]} : vector<1x128xf32> to vector<1x64xf32>
    %166 = vector.extract_strided_slice %163 {offsets = [0, 0], sizes = [1, 64], strides = [1, 1]} : vector<1x128xf32> to vector<1x64xf32>
    %167 = arith.addf %165, %166 : vector<1x64xf32>
    %168 = arith.negf %167 : vector<1x64xf32>
    %169 = math.exp %168 : vector<1x64xf32>
    %cst_31 = arith.constant 1.000000e+00 : f32
    %170 = vector.broadcast %cst_31 : f32 to vector<1x64xf32>
    %171 = arith.addf %170, %169 : vector<1x64xf32>
    %172 = arith.divf %170, %171 : vector<1x64xf32>
    %173 = vector.extract_strided_slice %172 {offsets = [0, 0], sizes = [1, 32], strides = [1, 1]} : vector<1x64xf32> to vector<1x32xf32>
    %174 = vector.extract_strided_slice %172 {offsets = [0, 32], sizes = [1, 32], strides = [1, 1]} : vector<1x64xf32> to vector<1x32xf32>
    %175 = vector.extract_strided_slice %164 {offsets = [0, 64], sizes = [1, 32], strides = [1, 1]} : vector<1x128xf32> to vector<1x32xf32>
    %176 = vector.extract_strided_slice %163 {offsets = [0, 64], sizes = [1, 32], strides = [1, 1]} : vector<1x128xf32> to vector<1x32xf32>
    %177 = arith.addf %176, %7 : vector<1x32xf32>
    %178 = arith.mulf %173, %177 : vector<1x32xf32>
    %179 = arith.addf %175, %178 : vector<1x32xf32>
    %180 = math.tanh %179 : vector<1x32xf32>
    %181 = arith.subf %160, %180 : vector<1x32xf32>
    %182 = arith.mulf %174, %181 : vector<1x32xf32>
    %183 = arith.addf %180, %182 : vector<1x32xf32>
    %c7 = arith.constant 7 : index
    %c0_32 = arith.constant 0 : index
    %184 = vector.load %arg5[%c7, %c0_32] : memref<10x32xf32, #tpu.memory_space<vmem>>, vector<1x32xf32>
    tpu.vector_store %arg5[%c7, %c0_32], %183 {strides = array<i32>} : memref<10x32xf32, #tpu.memory_space<vmem>>, vector<1x32xf32>,
    %185 = arith.truncf %183 : vector<1x32xf32> to vector<1x32xbf16>
    %cst_33 = arith.constant dense<0.000000e+00> : vector<1x128xf32>
    %186 = tpu.matmul %185, %6, %cst_33 {dimension_numbers = #tpu.dot_dimension_numbers<[1], [0], [0], [1], [0, 0, 1, 1], [], []>} : vector<1x32xbf16>, vector<32x128xbf16>, vector<1x128xf32> -> vector<1x128xf32>
    %187 = vector.extract_strided_slice %5 {offsets = [8, 0], sizes = [1, 128], strides = [1, 1]} : vector<10x128xf32> to vector<1x128xf32>
    %188 = vector.extract_strided_slice %187 {offsets = [0, 0], sizes = [1, 64], strides = [1, 1]} : vector<1x128xf32> to vector<1x64xf32>
    %189 = vector.extract_strided_slice %186 {offsets = [0, 0], sizes = [1, 64], strides = [1, 1]} : vector<1x128xf32> to vector<1x64xf32>
    %190 = arith.addf %188, %189 : vector<1x64xf32>
    %191 = arith.negf %190 : vector<1x64xf32>
    %192 = math.exp %191 : vector<1x64xf32>
    %cst_34 = arith.constant 1.000000e+00 : f32
    %193 = vector.broadcast %cst_34 : f32 to vector<1x64xf32>
    %194 = arith.addf %193, %192 : vector<1x64xf32>
    %195 = arith.divf %193, %194 : vector<1x64xf32>
    %196 = vector.extract_strided_slice %195 {offsets = [0, 0], sizes = [1, 32], strides = [1, 1]} : vector<1x64xf32> to vector<1x32xf32>
    %197 = vector.extract_strided_slice %195 {offsets = [0, 32], sizes = [1, 32], strides = [1, 1]} : vector<1x64xf32> to vector<1x32xf32>
    %198 = vector.extract_strided_slice %187 {offsets = [0, 64], sizes = [1, 32], strides = [1, 1]} : vector<1x128xf32> to vector<1x32xf32>
    %199 = vector.extract_strided_slice %186 {offsets = [0, 64], sizes = [1, 32], strides = [1, 1]} : vector<1x128xf32> to vector<1x32xf32>
    %200 = arith.addf %199, %7 : vector<1x32xf32>
    %201 = arith.mulf %196, %200 : vector<1x32xf32>
    %202 = arith.addf %198, %201 : vector<1x32xf32>
    %203 = math.tanh %202 : vector<1x32xf32>
    %204 = arith.subf %183, %203 : vector<1x32xf32>
    %205 = arith.mulf %197, %204 : vector<1x32xf32>
    %206 = arith.addf %203, %205 : vector<1x32xf32>
    %c8 = arith.constant 8 : index
    %c0_35 = arith.constant 0 : index
    %207 = vector.load %arg5[%c8, %c0_35] : memref<10x32xf32, #tpu.memory_space<vmem>>, vector<1x32xf32>
    tpu.vector_store %arg5[%c8, %c0_35], %206 {strides = array<i32>} : memref<10x32xf32, #tpu.memory_space<vmem>>, vector<1x32xf32>,
    %208 = arith.truncf %206 : vector<1x32xf32> to vector<1x32xbf16>
    %cst_36 = arith.constant dense<0.000000e+00> : vector<1x128xf32>
    %209 = tpu.matmul %208, %6, %cst_36 {dimension_numbers = #tpu.dot_dimension_numbers<[1], [0], [0], [1], [0, 0, 1, 1], [], []>} : vector<1x32xbf16>, vector<32x128xbf16>, vector<1x128xf32> -> vector<1x128xf32>
    %210 = vector.extract_strided_slice %5 {offsets = [9, 0], sizes = [1, 128], strides = [1, 1]} : vector<10x128xf32> to vector<1x128xf32>
    %211 = vector.extract_strided_slice %210 {offsets = [0, 0], sizes = [1, 64], strides = [1, 1]} : vector<1x128xf32> to vector<1x64xf32>
    %212 = vector.extract_strided_slice %209 {offsets = [0, 0], sizes = [1, 64], strides = [1, 1]} : vector<1x128xf32> to vector<1x64xf32>
    %213 = arith.addf %211, %212 : vector<1x64xf32>
    %214 = arith.negf %213 : vector<1x64xf32>
    %215 = math.exp %214 : vector<1x64xf32>
    %cst_37 = arith.constant 1.000000e+00 : f32
    %216 = vector.broadcast %cst_37 : f32 to vector<1x64xf32>
    %217 = arith.addf %216, %215 : vector<1x64xf32>
    %218 = arith.divf %216, %217 : vector<1x64xf32>
    %219 = vector.extract_strided_slice %218 {offsets = [0, 0], sizes = [1, 32], strides = [1, 1]} : vector<1x64xf32> to vector<1x32xf32>
    %220 = vector.extract_strided_slice %218 {offsets = [0, 32], sizes = [1, 32], strides = [1, 1]} : vector<1x64xf32> to vector<1x32xf32>
    %221 = vector.extract_strided_slice %210 {offsets = [0, 64], sizes = [1, 32], strides = [1, 1]} : vector<1x128xf32> to vector<1x32xf32>
    %222 = vector.extract_strided_slice %209 {offsets = [0, 64], sizes = [1, 32], strides = [1, 1]} : vector<1x128xf32> to vector<1x32xf32>
    %223 = arith.addf %222, %7 : vector<1x32xf32>
    %224 = arith.mulf %219, %223 : vector<1x32xf32>
    %225 = arith.addf %221, %224 : vector<1x32xf32>
    %226 = math.tanh %225 : vector<1x32xf32>
    %227 = arith.subf %206, %226 : vector<1x32xf32>
    %228 = arith.mulf %220, %227 : vector<1x32xf32>
    %229 = arith.addf %226, %228 : vector<1x32xf32>
    %c9 = arith.constant 9 : index
    %c0_38 = arith.constant 0 : index
    %230 = vector.load %arg5[%c9, %c0_38] : memref<10x32xf32, #tpu.memory_space<vmem>>, vector<1x32xf32>
    tpu.vector_store %arg5[%c9, %c0_38], %229 {strides = array<i32>} : memref<10x32xf32, #tpu.memory_space<vmem>>, vector<1x32xf32>,
    return
  }
}

</mosaic_0001>

<bundles_post_ra>
// kernel: gru_t7_forward.1
= control target key start
LH: loop header
LB: loop body
LE: loop exit
PB: predicated region body
PF: predicated region fallthrough
CT: control target
= control target key end

     0   :  { %vm38_vm0 = vcmask 523264   ;;  %s1225_s15 = smov 64   ;;  %v225_v23 = vlaneseq  ;;  %v1227_v28 = vmov 0.0   ;;  %vm1228_vm1 = vmmov 0   ;;  %s1229_s19 = smov 32   ;;  %s1545_s1 = inlined_call_operand.vmem [shape: f32[64,128], index: 1, kind: input, shape index: {}]   ;;  %s1546_s0 = inlined_call_operand.vmem [shape: f32[10,64], index: 0, kind: input, shape index: {}]   ;;  %s1547_s3 = inlined_call_operand.vmem [shape: f32[1,128], index: 3, kind: input, shape index: {}]   ;;  %s1548_s4 = inlined_call_operand.vmem [shape: f32[1,32], index: 4, kind: input, shape index: {}]   ;;  %s1549_s2 = inlined_call_operand.vmem [shape: bf16[32,128], index: 2, kind: input, shape index: {}]   ;;  %s1550_s5 = inlined_call_operand.vmem [shape: f32[10,32], index: 5, kind: output, shape index: {}]  }
   0x1   :  { %v30_v0 = vld [vmem:[%s1545_s1 + $0x38] sm:$0xff]  ;;  %v29_v1 = vld [vmem:[%s1545_s1 + $0x30] sm:$0xff]  ;;  %v28_v2 = vld [vmem:[%s1545_s1 + $0x28] sm:$0xff]  ;;  %1086 = vmatprep.subr.bf16.mxu1 %v1227_v28  ;;  %1090 = vmatprep.mubr.msk.bf16.mxu1 %vm1228_vm1, %v1227_v28  ;;  %vm170_vm2 = vcmask 261120   ;;  %vm152_vm3 = vcmask 253952   ;;  %vm357_vm4 = vcmask 256002  }
   0x2   :  { %1067 = vmatprep.subr.mxu0 %v30_v0  ;;  %v21_v3 = vld [vmem:[%s1546_s0] sm:$0xff]  ;;  %v26_v5 = vld [vmem:[%s1545_s1 + $0x18] sm:$0xff]  ;;  %v25_v6 = vld [vmem:[%s1545_s1 + $0x10] sm:$0xff]  ;;  %v226_v24 = vshrl.u32 %v225_v23, 7  ;;  %vm543_vm5 = vcmask 258052   ;;  %vm729_vm6 = vcmask 260102  }
   0x3   :  { %1068 = vmatpush3.msra.mxu0 %v30_v0  ;;  %1083 = vmatprep.mubr.msk.f32.mxu0 %vm38_vm0, %v21_v3  ;;  %v27_v4 = vld [vmem:[%s1545_s1 + $0x20] sm:$0xff]  ;;  %v24_v7 = vld [vmem:[%s1545_s1 + $0x8] sm:$0xff]  ;;  %vm264_vm7 = vcmask 254977   ;;  %vm449_vm8 = vcmask 257027   ;;  %vm635_vm9 = vcmask 259077   ;;  %vm821_vm10 = vcmask 261127  }
   0x4   :  { %1069 = vmatprep.subr.mxu0 %v29_v1  ;;  %v23_v8 = vld [vmem:[%s1545_s1] sm:$0xff]  ;;  %v22_v9 = vld [vmem:[%s1546_s0 + $0x8] sm:$0x3]  ;;  %v227_v25 = vsub.s32 0, %v226_v24 }
   0x5   :  { %1070 = vmatpush3.msra.mxu0 %v29_v1  ;;  %v1006_v10 = vld [vmem:[%s1547_s3] ss:$0 sm:$0xff]  ;;  %s1226_s3 = smov 96   ;;  %v1311_v29 = vld [vmem:[%s1549_s2 + $0x8] sm:$0xff]  }
   0x6   :  { %1071 = vmatprep.subr.mxu0 %v28_v2  ;;  %v124_v18 = vld [vmem:[%s1548_s4] sm:$0x1]  ;;  %1087 = vmatpush3.bf16.msra.mxu1 %v1311_v29 }
   0x7   :  { %1072 = vmatpush3.msra.mxu0 %v28_v2  ;;  %v228_v27 = vrot.slane %v124_v18, %v227_v25  ;;  %v1322_v30 = vld [vmem:[%s1549_s2] sm:$0xff]   ;;  %1088 = vmatprep.subr.bf16.mxu1 %v1227_v28 }
   0x8   :  { %1073 = vmatprep.subr.mxu0 %v27_v4 }
   0x9   :  { %1074 = vmatpush3.msra.mxu0 %v27_v4 }
   0xa   :  { %1075 = vmatprep.subr.mxu0 %v26_v5  ;;  %1089 = vmatpush3.bf16.msra.mxu1 %v1322_v30 }
   0xb   :  { %1076 = vmatpush3.msra.mxu0 %v26_v5  ;;  %1094 = vmatprep.subr.bf16.mxu1 %v1227_v28 }
   0xc   :  { %1077 = vmatprep.subr.mxu0 %v25_v6 }
   0xd   :  { %1078 = vmatpush3.msra.mxu0 %v25_v6 }
   0xe   :  { %1079 = vmatprep.subr.mxu0 %v24_v7 }
   0xf   :  { %1080 = vmatpush3.msra.mxu0 %v24_v7 }
  0x10   :  { %1081 = vmatprep.subr.mxu0 %v23_v8 }
  0x11   :  { %1082 = vmatpush3.msra.mxu0 %v23_v8 }
  0x12   :  { %1084 = vmatmul.mubr.msk.f32.vlgmr.msra.gmra.mxu0 %vm38_vm0, %v22_v9  ;;  %1102 = vmatprep.subr.bf16.mxu0 %v1227_v28 }
  0x13   :  { %1106 = vmatprep.mubr.msk.bf16.mxu0 %vm1228_vm1, %v1227_v28  ;;  %1103 = vmatpush3.bf16.msra.mxu0 %v1311_v29 }
  0x14   :  { %1104 = vmatprep.subr.bf16.mxu0 %v1227_v28 }
  0x17   :  { %1105 = vmatpush3.bf16.msra.mxu0 %v1322_v30 }
  0x18   :  { %1118 = vmatprep.subr.bf16.mxu0 %v1227_v28 }
  0xd2   :  { %v1085_v11 = vpop.f32.mrf.mxu0 }
  0xd3   :  { %v1295_v12 = vadd.f32 %v1085_v11, %v1006_v10 }
  0xd4   :  { %v111_v13 = vpop.f32.mrf.mxu0 }
  0xd5   :  { %v1297_v14 = vadd.f32 %v1006_v10, %v111_v13 }
  0xd7   :  { %v1009_v15 = vmul.f32 -1.442695, %v1297_v14 }
  0xd9   :  { %1165 = vpow2.f32 %v1009_v15 }
  0xe6   :  { %v1166_v16 = vpop.eup %1165 }
  0xe7   :  { %v128_v17 = vadd.f32 1.0, %v1166_v16 }
  0xe9   :  { %1167 = vrcp.f32 %v128_v17 }
  0xf6   :  { %v1168_v19 = vpop.eup %1167 }
  0xf7   :  { %v131_v20 = vmul.f32 %v1168_v19, %v124_v18 }
  0xf9   :  { %133 = vrot.lane.b32.xlu0 %v131_v20, %s1225_s15 }
 0x16b   :  { %v134_v21 = vpop.permute.xlu0 %133 }
 0x16c   :  { %v136_v22 = vadd.f32 %v134_v21, %v1297_v14 }
 0x16e   :  { %1169 = vtanh.f32 %v136_v22 }
 0x17b   :  { %v1170_v26 = vpop.eup %1169 }
 0x17c   :  { %139 = vrot.lane.b32.xlu0 %v1170_v26, %s1226_s3 }
 0x180   :  { %229 = vrot.lane.b32.xlu0 %v228_v27, %s1225_s15 }
 0x1ee   :  { %v140_v31 = vpop.permute.xlu0 %139 }
 0x1ef   :  { %v142_v32 = vmul.f32 %v1168_v19, %v140_v31 }
 0x1f1   :  { %144 = vrot.lane.b32.xlu1 %v142_v32, %s1229_s19 }
 0x1f2   :  { %v1344_v37 = vpop.permute.xlu0 %229 }
 0x263   :  { %v145_v33 = vpop.permute.xlu1 %144 }
 0x264   :  { %v1332_v34 = vsub.f32 %v1170_v26, %v145_v33 }
 0x266   :  { %v154_v35 = vpack.c.bf16 %v1332_v34, %v1332_v34 }
 0x268   :  { %156 = vrot.lane.b32.xlu1 %v154_v35, %s1225_s15 }
 0x2da   :  { %v157_v36 = vpop.permute.xlu1 %156 }
 0x2db   :  { %1091 = vmatmul.mubr.msk.bf16.vlgmr.msra.gmra.mxu1 %vm170_vm2, %v157_v36 }
 0x2dc   :  { %1095 = vmatpush3.bf16.msra.mxu1 %v1311_v29  ;;  %1098 = vmatprep.mubr.msk.bf16.mxu1 %vm1228_vm1, %v1227_v28 }
 0x2dd   :  { %1096 = vmatprep.subr.bf16.mxu1 %v1227_v28 }
 0x2e0   :  { %1097 = vmatpush3.bf16.msra.mxu1 %v1322_v30 }
 0x2e1   :  { %1110 = vmatprep.subr.bf16.mxu1 %v1227_v28 }
 0x39b   :  { %v208_v38 = vpop.f32.mrf.mxu1 }
 0x39c   :  { %v232_v39 = vadd.f32 %v1344_v37, %v208_v38  ;;  %v215_v44 = vrot.slane %v208_v38, 7 }
 0x39d   :  { %v1092_v40 = vpop.f32.mrf.mxu1 }
 0x39e   :  { %v234_v41 = vrot.slane %v232_v39, 7  ;;  %v217_v45 = vadd.f32 %v215_v44, %v1297_v14 }
 0x39f   :  { %v211_v42 = vpop.f32.mrf.mxu1 }
 0x3a0   :  { %235 = vrot.lane.b32.xlu1 %v234_v41, %s1225_s15  ;;  %v1013_v46 = vmul.f32 -1.442695, %v217_v45 }
 0x3a1   :  { %v1093_v43 = vpop.f32.mrf.mxu1 }
 0x3a2   :  { %1171 = vpow2.f32 %v1013_v46 }
 0x3af   :  { %v1172_v47 = vpop.eup %1171 }
 0x3b0   :  { %v221_v48 = vadd.f32 1.0, %v1172_v47 }
 0x3b2   :  { %1173 = vrcp.f32 %v221_v48 }
 0x3bf   :  { %v1174_v49 = vpop.eup %1173 }
 0x412   :  { %v236_v50 = vpop.permute.xlu1 %235 }
 0x413   :  { %v238_v51 = vmul.f32 %v1174_v49, %v236_v50 }
 0x415   :  { %240 = vrot.lane.b32.xlu0 %v238_v51, %s1225_s15 }
 0x487   :  { %v241_v52 = vpop.permute.xlu0 %240 }
 0x488   :  { %v243_v53 = vadd.f32 %v241_v52, %v1297_v14 }
 0x48a   :  { %1175 = vtanh.f32 %v243_v53 }
 0x497   :  { %v1176_v54 = vpop.eup %1175 }
 0x498   :  { %v246_v55 = vrot.slane %v1176_v54, 1 }
 0x49a   :  { %v248_v56 = vsub.f32 %v1332_v34, %v246_v55 }
 0x49c   :  { %v250_v57 = vrot.slane %v248_v56, 7 }
 0x49e   :  { %251 = vrot.lane.b32.xlu1 %v250_v57, %s1226_s3 }
 0x510   :  { %v252_v58 = vpop.permute.xlu1 %251 }
 0x511   :  { %v254_v59 = vmul.f32 %v1174_v49, %v252_v58 }
 0x513   :  { %256 = vrot.lane.b32.xlu0 %v254_v59, %s1229_s19 }
 0x585   :  { %v257_v60 = vpop.permute.xlu0 %256 }
 0x586   :  { %v1354_v61 = vadd.f32 %v1176_v54, %v257_v60 }
 0x588   :  { %v266_v62 = vpack.c.bf16 %v1354_v61, %v1354_v61 }
 0x58a   :  { %v268_v63 = vshrl.u32 %v266_v62, 16 }
 0x58c   :  { %270 = vrot.lane.b32.xlu1 %v268_v63, %s1225_s15 }
 0x5fe   :  { %v271_v0 = vpop.permute.xlu1 %270 }
 0x5ff   :  { %1099 = vmatmul.mubr.msk.bf16.vlgmr.msra.gmra.mxu1 %vm170_vm2, %v271_v0 }
 0x600   :  { %1111 = vmatpush3.bf16.msra.mxu1 %v1311_v29  ;;  %1114 = vmatprep.mubr.msk.bf16.mxu1 %vm1228_vm1, %v1227_v28 }
 0x601   :  { %1112 = vmatprep.subr.bf16.mxu1 %v1227_v28 }
 0x604   :  { %1113 = vmatpush3.bf16.msra.mxu1 %v1322_v30 }
 0x605   :  { %1126 = vmatprep.subr.bf16.mxu1 %v1227_v28 }
 0x6bf   :  { %v309_v1 = vpop.f32.mrf.mxu1 }
 0x6c0   :  { %v325_v2 = vadd.f32 %v309_v1, %v1344_v37  ;;  %v316_v7 = vrot.slane %v309_v1, 6 }
 0x6c1   :  { %v1100_v3 = vpop.f32.mrf.mxu1 }
 0x6c2   :  { %v327_v4 = vrot.slane %v325_v2, 6  ;;  %v318_v8 = vadd.f32 %v316_v7, %v1297_v14 }
 0x6c3   :  { %v312_v5 = vpop.f32.mrf.mxu1 }
 0x6c4   :  { %328 = vrot.lane.b32.xlu0 %v327_v4, %s1225_s15  ;;  %v1015_v9 = vmul.f32 -1.442695, %v318_v8 }
 0x6c5   :  { %v1101_v6 = vpop.f32.mrf.mxu1 }
 0x6c6   :  { %1177 = vpow2.f32 %v1015_v9 }
 0x6d3   :  { %v1178_v10 = vpop.eup %1177 }
 0x6d4   :  { %v322_v11 = vadd.f32 1.0, %v1178_v10 }
 0x6d6   :  { %1179 = vrcp.f32 %v322_v11 }
 0x6e3   :  { %v1180_v13 = vpop.eup %1179 }
 0x736   :  { %v329_v15 = vpop.permute.xlu0 %328 }
 0x737   :  { %v331_v16 = vmul.f32 %v1180_v13, %v329_v15 }
 0x739   :  { %333 = vrot.lane.b32.xlu1 %v331_v16, %s1225_s15 }
 0x7ab   :  { %v334_v17 = vpop.permute.xlu1 %333 }
 0x7ac   :  { %v336_v18 = vadd.f32 %v334_v17, %v1297_v14 }
 0x7ae   :  { %1181 = vtanh.f32 %v336_v18 }
 0x7bb   :  { %v1182_v19 = vpop.eup %1181 }
 0x7bc   :  { %v339_v20 = vrot.slane %v1182_v19, 1 }
 0x7be   :  { %v341_v21 = vsub.f32 %v1354_v61, %v339_v20 }
 0x7c0   :  { %v343_v22 = vrot.slane %v341_v21, 7 }
 0x7c2   :  { %344 = vrot.lane.b32.xlu0 %v343_v22, %s1226_s3 }
 0x834   :  { %v345_v23 = vpop.permute.xlu0 %344 }
 0x835   :  { %v347_v24 = vmul.f32 %v1180_v13, %v345_v23 }
 0x837   :  { %349 = vrot.lane.b32.xlu1 %v347_v24, %s1229_s19 }
 0x8a9   :  { %v350_v25 = vpop.permute.xlu1 %349 }
 0x8aa   :  { %v1374_v26 = vadd.f32 %v1182_v19, %v350_v25 }
 0x8ac   :  { %v359_v27 = vpack.c.bf16 %v1374_v26, %v1374_v26 }
 0x8ae   :  { %v361_v31 = vrot.slane %v359_v27, 1 }
 0x8b0   :  { %362 = vrot.lane.b32.xlu0 %v361_v31, %s1225_s15 }
 0x922   :  { %v363_v32 = vpop.permute.xlu0 %362 }
 0x923   :  { %1107 = vmatmul.mubr.msk.bf16.vlgmr.msra.gmra.mxu0 %vm170_vm2, %v363_v32 }
 0x924   :  { %1119 = vmatpush3.bf16.msra.mxu0 %v1311_v29  ;;  %1122 = vmatprep.mubr.msk.bf16.mxu0 %vm1228_vm1, %v1227_v28 }
 0x925   :  { %1120 = vmatprep.subr.bf16.mxu0 %v1227_v28 }
 0x928   :  { %1121 = vmatpush3.bf16.msra.mxu0 %v1322_v30 }
 0x929   :  { %1134 = vmatprep.subr.bf16.mxu0 %v1227_v28 }
 0x9e3   :  { %v401_v33 = vpop.f32.mrf.mxu0 }
 0x9e4   :  { %v417_v35 = vadd.f32 %v401_v33, %v1344_v37  ;;  %v408_v41 = vrot.slane %v401_v33, 5 }
 0x9e5   :  { %v1108_v36 = vpop.f32.mrf.mxu0 }
 0x9e6   :  { %v419_v38 = vrot.slane %v417_v35, 5  ;;  %v410_v42 = vadd.f32 %v408_v41, %v1297_v14 }
 0x9e7   :  { %v404_v39 = vpop.f32.mrf.mxu0 }
 0x9e8   :  { %420 = vrot.lane.b32.xlu1 %v419_v38, %s1225_s15  ;;  %v1017_v43 = vmul.f32 -1.442695, %v410_v42 }
 0x9e9   :  { %v1109_v40 = vpop.f32.mrf.mxu0 }
 0x9ea   :  { %1183 = vpow2.f32 %v1017_v43 }
 0x9f7   :  { %v1184_v44 = vpop.eup %1183 }
 0x9f8   :  { %v414_v45 = vadd.f32 1.0, %v1184_v44 }
 0x9fa   :  { %1185 = vrcp.f32 %v414_v45 }
 0xa07   :  { %v1186_v46 = vpop.eup %1185 }
 0xa5a   :  { %v421_v47 = vpop.permute.xlu1 %420 }
 0xa5b   :  { %v423_v48 = vmul.f32 %v1186_v46, %v421_v47 }
 0xa5d   :  { %425 = vrot.lane.b32.xlu0 %v423_v48, %s1225_s15 }
 0xacf   :  { %v426_v49 = vpop.permute.xlu0 %425 }
 0xad0   :  { %v428_v50 = vadd.f32 %v426_v49, %v1297_v14 }
 0xad2   :  { %1187 = vtanh.f32 %v428_v50 }
 0xadf   :  { %v1188_v51 = vpop.eup %1187 }
 0xae0   :  { %v431_v52 = vrot.slane %v1188_v51, 1 }
 0xae2   :  { %v433_v53 = vsub.f32 %v1374_v26, %v431_v52 }
 0xae4   :  { %v435_v54 = vrot.slane %v433_v53, 7 }
 0xae6   :  { %436 = vrot.lane.b32.xlu1 %v435_v54, %s1226_s3 }
 0xb58   :  { %v437_v55 = vpop.permute.xlu1 %436 }
 0xb59   :  { %v439_v56 = vmul.f32 %v1186_v46, %v437_v55 }
 0xb5b   :  { %441 = vrot.lane.b32.xlu0 %v439_v56, %s1229_s19 }
 0xbcd   :  { %v442_v57 = vpop.permute.xlu0 %441 }
 0xbce   :  { %v1394_v58 = vadd.f32 %v1188_v51, %v442_v57 }
 0xbd0   :  { %v451_v59 = vpack.c.bf16 %v1394_v58, %v1394_v58 }
 0xbd2   :  { %v453_v60 = vshrl.u32 %v451_v59, 16 }
 0xbd4   :  { %v455_v62 = vrot.slane %v453_v60, 1 }
 0xbd6   :  { %456 = vrot.lane.b32.xlu1 %v455_v62, %s1225_s15 }
 0xc48   :  { %v457_v63 = vpop.permute.xlu1 %456 }
 0xc49   :  { %1115 = vmatmul.mubr.msk.bf16.vlgmr.msra.gmra.mxu1 %vm170_vm2, %v457_v63 }
 0xc4a   :  { %1127 = vmatpush3.bf16.msra.mxu1 %v1311_v29  ;;  %1130 = vmatprep.mubr.msk.bf16.mxu1 %vm1228_vm1, %v1227_v28 }
 0xc4b   :  { %1128 = vmatprep.subr.bf16.mxu1 %v1227_v28 }
 0xc4e   :  { %1129 = vmatpush3.bf16.msra.mxu1 %v1322_v30 }
 0xc4f   :  { %1142 = vmatprep.subr.bf16.mxu1 %v1227_v28 }
 0xd09   :  { %v495_v0 = vpop.f32.mrf.mxu1 }
 0xd0a   :  { %v511_v1 = vadd.f32 %v495_v0, %v1344_v37  ;;  %v502_v6 = vrot.slane %v495_v0, 4 }
 0xd0b   :  { %v1116_v2 = vpop.f32.mrf.mxu1 }
 0xd0c   :  { %v513_v3 = vrot.slane %v511_v1, 4  ;;  %v504_v7 = vadd.f32 %v502_v6, %v1297_v14 }
 0xd0d   :  { %v498_v4 = vpop.f32.mrf.mxu1 }
 0xd0e   :  { %514 = vrot.lane.b32.xlu0 %v513_v3, %s1225_s15  ;;  %v1019_v8 = vmul.f32 -1.442695, %v504_v7 }
 0xd0f   :  { %v1117_v5 = vpop.f32.mrf.mxu1 }
 0xd10   :  { %1189 = vpow2.f32 %v1019_v8 }
 0xd1d   :  { %v1190_v9 = vpop.eup %1189 }
 0xd1e   :  { %v508_v10 = vadd.f32 1.0, %v1190_v9 }
 0xd20   :  { %1191 = vrcp.f32 %v508_v10 }
 0xd2d   :  { %v1192_v11 = vpop.eup %1191 }
 0xd80   :  { %v515_v13 = vpop.permute.xlu0 %514 }
 0xd81   :  { %v517_v15 = vmul.f32 %v1192_v11, %v515_v13 }
 0xd83   :  { %519 = vrot.lane.b32.xlu1 %v517_v15, %s1225_s15 }
 0xdf5   :  { %v520_v16 = vpop.permute.xlu1 %519 }
 0xdf6   :  { %v522_v17 = vadd.f32 %v520_v16, %v1297_v14 }
 0xdf8   :  { %1193 = vtanh.f32 %v522_v17 }
 0xe05   :  { %v1194_v18 = vpop.eup %1193 }
 0xe06   :  { %v525_v19 = vrot.slane %v1194_v18, 1 }
 0xe08   :  { %v527_v20 = vsub.f32 %v1394_v58, %v525_v19 }
 0xe0a   :  { %v529_v21 = vrot.slane %v527_v20, 7 }
 0xe0c   :  { %530 = vrot.lane.b32.xlu0 %v529_v21, %s1226_s3 }
 0xe7e   :  { %v531_v22 = vpop.permute.xlu0 %530 }
 0xe7f   :  { %v533_v23 = vmul.f32 %v1192_v11, %v531_v22 }
 0xe81   :  { %535 = vrot.lane.b32.xlu1 %v533_v23, %s1229_s19 }
 0xef3   :  { %v536_v24 = vpop.permute.xlu1 %535 }
 0xef4   :  { %v1414_v25 = vadd.f32 %v1194_v18, %v536_v24 }
 0xef6   :  { %v545_v27 = vpack.c.bf16 %v1414_v25, %v1414_v25 }
 0xef8   :  { %v547_v31 = vrot.slane %v545_v27, 2 }
 0xefa   :  { %548 = vrot.lane.b32.xlu0 %v547_v31, %s1225_s15 }
 0xf6c   :  { %v549_v32 = vpop.permute.xlu0 %548 }
 0xf6d   :  { %1123 = vmatmul.mubr.msk.bf16.vlgmr.msra.gmra.mxu0 %vm170_vm2, %v549_v32 }
 0xf6e   :  { %1135 = vmatpush3.bf16.msra.mxu0 %v1311_v29  ;;  %1138 = vmatprep.mubr.msk.bf16.mxu0 %vm1228_vm1, %v1227_v28 }
 0xf6f   :  { %1136 = vmatprep.subr.bf16.mxu0 %v1227_v28 }
 0xf72   :  { %1137 = vmatpush3.bf16.msra.mxu0 %v1322_v30 }
 0xf73   :  { %1150 = vmatprep.subr.bf16.mxu0 %v1227_v28 }
0x102d   :  { %v587_v33 = vpop.f32.mrf.mxu0 }
0x102e   :  { %v603_v35 = vadd.f32 %v587_v33, %v1344_v37  ;;  %v594_v41 = vrot.slane %v587_v33, 3 }
0x102f   :  { %v1124_v36 = vpop.f32.mrf.mxu0 }
0x1030   :  { %v605_v38 = vrot.slane %v603_v35, 3  ;;  %v596_v42 = vadd.f32 %v594_v41, %v1297_v14 }
0x1031   :  { %v590_v39 = vpop.f32.mrf.mxu0 }
0x1032   :  { %606 = vrot.lane.b32.xlu1 %v605_v38, %s1225_s15  ;;  %v1021_v43 = vmul.f32 -1.442695, %v596_v42 }
0x1033   :  { %v1125_v40 = vpop.f32.mrf.mxu0 }
0x1034   :  { %1195 = vpow2.f32 %v1021_v43 }
0x1041   :  { %v1196_v44 = vpop.eup %1195 }
0x1042   :  { %v600_v45 = vadd.f32 1.0, %v1196_v44 }
0x1044   :  { %1197 = vrcp.f32 %v600_v45 }
0x1051   :  { %v1198_v46 = vpop.eup %1197 }
0x10a4   :  { %v607_v47 = vpop.permute.xlu1 %606 }
0x10a5   :  { %v609_v48 = vmul.f32 %v1198_v46, %v607_v47 }
0x10a7   :  { %611 = vrot.lane.b32.xlu0 %v609_v48, %s1225_s15 }
0x1119   :  { %v612_v49 = vpop.permute.xlu0 %611 }
0x111a   :  { %v614_v50 = vadd.f32 %v612_v49, %v1297_v14 }
0x111c   :  { %1199 = vtanh.f32 %v614_v50 }
0x1129   :  { %v1200_v51 = vpop.eup %1199 }
0x112a   :  { %v617_v52 = vrot.slane %v1200_v51, 1 }
0x112c   :  { %v619_v53 = vsub.f32 %v1414_v25, %v617_v52 }
0x112e   :  { %v621_v54 = vrot.slane %v619_v53, 7 }
0x1130   :  { %622 = vrot.lane.b32.xlu1 %v621_v54, %s1226_s3 }
0x11a2   :  { %v623_v55 = vpop.permute.xlu1 %622 }
0x11a3   :  { %v625_v56 = vmul.f32 %v1198_v46, %v623_v55 }
0x11a5   :  { %627 = vrot.lane.b32.xlu0 %v625_v56, %s1229_s19 }
0x1217   :  { %v628_v57 = vpop.permute.xlu0 %627 }
0x1218   :  { %v1434_v59 = vadd.f32 %v1200_v51, %v628_v57 }
0x121a   :  { %v637_v60 = vpack.c.bf16 %v1434_v59, %v1434_v59 }
0x121c   :  { %v639_v62 = vshrl.u32 %v637_v60, 16 }
0x121e   :  { %v641_v63 = vrot.slane %v639_v62, 2 }
0x1220   :  { %642 = vrot.lane.b32.xlu1 %v641_v63, %s1225_s15 }
0x1292   :  { %v643_v0 = vpop.permute.xlu1 %642 }
0x1293   :  { %1131 = vmatmul.mubr.msk.bf16.vlgmr.msra.gmra.mxu1 %vm170_vm2, %v643_v0 }
0x1294   :  { %1143 = vmatpush3.bf16.msra.mxu1 %v1311_v29  ;;  %1146 = vmatprep.mubr.msk.bf16.mxu1 %vm1228_vm1, %v1227_v28 }
0x1295   :  { %1144 = vmatprep.subr.bf16.mxu1 %v1227_v28 }
0x1298   :  { %1145 = vmatpush3.bf16.msra.mxu1 %v1322_v30 }
0x1353   :  { %v681_v1 = vpop.f32.mrf.mxu1 }
0x1354   :  { %v697_v2 = vadd.f32 %v681_v1, %v1344_v37  ;;  %v688_v7 = vrot.slane %v681_v1, 2 }
0x1355   :  { %v1132_v3 = vpop.f32.mrf.mxu1 }
0x1356   :  { %v699_v4 = vrot.slane %v697_v2, 2  ;;  %v690_v8 = vadd.f32 %v688_v7, %v1297_v14 }
0x1357   :  { %v684_v5 = vpop.f32.mrf.mxu1 }
0x1358   :  { %700 = vrot.lane.b32.xlu0 %v699_v4, %s1225_s15  ;;  %v1023_v9 = vmul.f32 -1.442695, %v690_v8 }
0x1359   :  { %v1133_v6 = vpop.f32.mrf.mxu1 }
0x135a   :  { %1201 = vpow2.f32 %v1023_v9 }
0x1367   :  { %v1202_v10 = vpop.eup %1201 }
0x1368   :  { %v694_v11 = vadd.f32 1.0, %v1202_v10 }
0x136a   :  { %1203 = vrcp.f32 %v694_v11 }
0x1377   :  { %v1204_v13 = vpop.eup %1203 }
0x13ca   :  { %v701_v15 = vpop.permute.xlu0 %700 }
0x13cb   :  { %v703_v16 = vmul.f32 %v1204_v13, %v701_v15 }
0x13cd   :  { %705 = vrot.lane.b32.xlu1 %v703_v16, %s1225_s15 }
0x143f   :  { %v706_v17 = vpop.permute.xlu1 %705 }
0x1440   :  { %v708_v18 = vadd.f32 %v706_v17, %v1297_v14 }
0x1442   :  { %1205 = vtanh.f32 %v708_v18 }
0x144f   :  { %v1206_v19 = vpop.eup %1205 }
0x1450   :  { %v711_v20 = vrot.slane %v1206_v19, 1 }
0x1452   :  { %v713_v21 = vsub.f32 %v1434_v59, %v711_v20 }
0x1454   :  { %v715_v22 = vrot.slane %v713_v21, 7 }
0x1456   :  { %716 = vrot.lane.b32.xlu0 %v715_v22, %s1226_s3 }
0x14c8   :  { %v717_v23 = vpop.permute.xlu0 %716 }
0x14c9   :  { %v719_v24 = vmul.f32 %v1204_v13, %v717_v23 }
0x14cb   :  { %721 = vrot.lane.b32.xlu1 %v719_v24, %s1229_s19 }
0x153d   :  { %v722_v27 = vpop.permute.xlu1 %721 }
0x153e   :  { %v1453_v31 = vadd.f32 %v1206_v19, %v722_v27 }
0x1540   :  { %v731_v32 = vpack.c.bf16 %v1453_v31, %v1453_v31 }
0x1542   :  { %v733_v33 = vrot.slane %v731_v32, 3 }
0x1544   :  { %734 = vrot.lane.b32.xlu0 %v733_v33, %s1225_s15 }
0x15b6   :  { %v735_v35 = vpop.permute.xlu0 %734 }
0x15b7   :  { %1139 = vmatmul.mubr.msk.bf16.vlgmr.msra.gmra.mxu0 %vm170_vm2, %v735_v35 }
0x15b8   :  { %1151 = vmatpush3.bf16.msra.mxu0 %v1311_v29  ;;  %1154 = vmatprep.mubr.msk.bf16.mxu0 %vm1228_vm1, %v1227_v28 }
0x15b9   :  { %1152 = vmatprep.subr.bf16.mxu0 %v1227_v28 }
0x15bc   :  { %1153 = vmatpush3.bf16.msra.mxu0 %v1322_v30 }
0x1677   :  { %v773_v36 = vpop.f32.mrf.mxu0 }
0x1678   :  { %v789_v38 = vadd.f32 %v773_v36, %v1344_v37  ;;  %v780_v43 = vrot.slane %v773_v36, 1 }
0x1679   :  { %v1140_v39 = vpop.f32.mrf.mxu0 }
0x167a   :  { %v791_v40 = vrot.slane %v789_v38, 1  ;;  %v782_v44 = vadd.f32 %v780_v43, %v1297_v14 }
0x167b   :  { %v776_v41 = vpop.f32.mrf.mxu0 }
0x167c   :  { %792 = vrot.lane.b32.xlu1 %v791_v40, %s1225_s15  ;;  %v1025_v29 = vmul.f32 -1.442695, %v782_v44 }
0x167d   :  { %v1141_v42 = vpop.f32.mrf.mxu0 }
0x167e   :  { %1207 = vpow2.f32 %v1025_v29 }
0x168b   :  { %v1208_v45 = vpop.eup %1207 }
0x168c   :  { %v786_v46 = vadd.f32 1.0, %v1208_v45 }
0x168e   :  { %1209 = vrcp.f32 %v786_v46 }
0x169b   :  { %v1210_v28 = vpop.eup %1209 }
0x16ee   :  { %v793_v47 = vpop.permute.xlu1 %792 }
0x16ef   :  { %v795_v30 = vmul.f32 %v1210_v28, %v793_v47 }
0x16f1   :  { %797 = vrot.lane.b32.xlu0 %v795_v30, %s1225_s15 }
0x1763   :  { %v798_v48 = vpop.permute.xlu0 %797 }
0x1764   :  { %v800_v49 = vadd.f32 %v798_v48, %v1297_v14 }
0x1766   :  { %1211 = vtanh.f32 %v800_v49 }
0x1773   :  { %v1212_v50 = vpop.eup %1211 }
0x1774   :  { %v803_v51 = vrot.slane %v1212_v50, 1 }
0x1776   :  { %v805_v52 = vsub.f32 %v1453_v31, %v803_v51 }
0x1778   :  { %v807_v53 = vrot.slane %v805_v52, 7 }
0x177a   :  { %808 = vrot.lane.b32.xlu1 %v807_v53, %s1226_s3 }
0x17ec   :  { %v809_v54 = vpop.permute.xlu1 %808 }
0x17ed   :  { %v811_v55 = vmul.f32 %v1210_v28, %v809_v54 }
0x17ef   :  { %813 = vrot.lane.b32.xlu0 %v811_v55, %s1229_s19 }
0x1861   :  { %v814_v56 = vpop.permute.xlu0 %813 }
0x1862   :  { %v1472_v57 = vadd.f32 %v1212_v50, %v814_v56 }
0x1864   :  { %v823_v60 = vpack.c.bf16 %v1472_v57, %v1472_v57 }
0x1866   :  { %v825_v62 = vshrl.u32 %v823_v60, 16 }
0x1868   :  { %v827_v14 = vrot.slane %v825_v62, 3 }
0x186a   :  { %828 = vrot.lane.b32.xlu1 %v827_v14, %s1225_s15 }
0x18dc   :  { %v829_v63 = vpop.permute.xlu1 %828 }
0x18dd   :  { %1147 = vmatmul.mubr.msk.bf16.vlgmr.msra.gmra.mxu1 %vm170_vm2, %v829_v63 }
0x199d   :  { %v867_v0 = vpop.f32.mrf.mxu1 }
0x199e   :  { %v880_v1 = vadd.f32 %v867_v0, %v1344_v37  ;;  %v873_v5 = vadd.f32 %v867_v0, %v1295_v12 }
0x199f   :  { %v1148_v2 = vpop.f32.mrf.mxu1 }
0x19a0   :  { %882 = vrot.lane.b32.xlu0 %v880_v1, %s1225_s15  ;;  %v1027_v6 = vmul.f32 -1.442695, %v873_v5 }
0x19a1   :  { %v870_v3 = vpop.f32.mrf.mxu1 }
0x19a2   :  { %1213 = vpow2.f32 %v1027_v6 }
0x19a3   :  { %v1149_v4 = vpop.f32.mrf.mxu1 }
0x19af   :  { %v1214_v7 = vpop.eup %1213 }
0x19b0   :  { %v877_v8 = vadd.f32 1.0, %v1214_v7 }
0x19b2   :  { %1215 = vrcp.f32 %v877_v8 }
0x19bf   :  { %v1216_v9 = vpop.eup %1215 }
0x1a12   :  { %v883_v10 = vpop.permute.xlu0 %882 }
0x1a13   :  { %v885_v11 = vmul.f32 %v1216_v9, %v883_v10 }
0x1a15   :  { %887 = vrot.lane.b32.xlu1 %v885_v11, %s1225_s15 }
0x1a87   :  { %v888_v13 = vpop.permute.xlu1 %887 }
0x1a88   :  { %v890_v15 = vadd.f32 %v888_v13, %v1295_v12 }
0x1a8a   :  { %1217 = vtanh.f32 %v890_v15 }
0x1a97   :  { %v1218_v16 = vpop.eup %1217 }
0x1a98   :  { %v893_v17 = vrot.slane %v1218_v16, 1 }
0x1a9a   :  { %v895_v18 = vsub.f32 %v1472_v57, %v893_v17 }
0x1a9c   :  { %v897_v19 = vrot.slane %v895_v18, 7 }
0x1a9e   :  { %898 = vrot.lane.b32.xlu0 %v897_v19, %s1226_s3 }
0x1b10   :  { %v899_v20 = vpop.permute.xlu0 %898 }
0x1b11   :  { %v901_v21 = vmul.f32 %v1216_v9, %v899_v20 }
0x1b13   :  { %903 = vrot.lane.b32.xlu1 %v901_v21, %s1229_s19 }
0x1b85   :  { %v904_v22 = vpop.permute.xlu1 %903 }
0x1b86   :  { %v906_v23 = vadd.f32 %v1218_v16, %v904_v22 }
0x1b88   :  { %v912_v24 = vpack.c.bf16 %v906_v23, %v906_v23 }
0x1b8a   :  { %914 = vrot.lane.b32.xlu0 %v912_v24, %s1225_s15 }
0x1bfc   :  { %v915_v27 = vpop.permute.xlu0 %914 }
0x1bfd   :  { %1155 = vmatmul.mubr.msk.bf16.vlgmr.msra.gmra.mxu0 %vm170_vm2, %v915_v27 }
0x1cbd   :  { %v953_v32 = vpop.f32.mrf.mxu0 }
0x1cbe   :  { %v969_v33 = vadd.f32 %v953_v32, %v1344_v37  ;;  %v960_v40 = vrot.slane %v953_v32, 7 }
0x1cbf   :  { %v1156_v35 = vpop.f32.mrf.mxu0 }
0x1cc0   :  { %v971_v36 = vrot.slane %v969_v33, 7  ;;  %v962_v41 = vadd.f32 %v960_v40, %v1295_v12 }
0x1cc1   :  { %v956_v38 = vpop.f32.mrf.mxu0 }
0x1cc2   :  { %972 = vrot.lane.b32.xlu1 %v971_v36, %s1225_s15  ;;  %v1029_v42 = vmul.f32 -1.442695, %v962_v41 }
0x1cc3   :  { %v1157_v39 = vpop.f32.mrf.mxu0 }
0x1cc4   :  { %1219 = vpow2.f32 %v1029_v42 }
0x1cd1   :  { %v1220_v43 = vpop.eup %1219 }
0x1cd2   :  { %v966_v44 = vadd.f32 1.0, %v1220_v43 }
0x1cd4   :  { %1221 = vrcp.f32 %v966_v44 }
0x1ce1   :  { %v1222_v29 = vpop.eup %1221 }
0x1d34   :  { %v973_v45 = vpop.permute.xlu1 %972 }
0x1d35   :  { %v975_v46 = vmul.f32 %v1222_v29, %v973_v45 }
0x1d37   :  { %977 = vrot.lane.b32.xlu0 %v975_v46, %s1225_s15 }
0x1da9   :  { %v978_v37 = vpop.permute.xlu0 %977 }
0x1daa   :  { %v980_v28 = vadd.f32 %v978_v37, %v1295_v12 }
0x1dac   :  { %1223 = vtanh.f32 %v980_v28 }
0x1db9   :  { %v1224_v47 = vpop.eup %1223 }
0x1dba   :  { %v983_v30 = vrot.slane %v1224_v47, 1 }
0x1dbc   :  { %v985_v48 = vsub.f32 %v906_v23, %v983_v30 }
0x1dbe   :  { %v987_v49 = vrot.slane %v985_v48, 7 }
0x1dc0   :  { %988 = vrot.lane.b32.xlu1 %v987_v49, %s1226_s3 }
0x1dc4   :  { %149 = vrot.lane.b32.xlu1 %v1332_v34, %s1225_s15 }
0x1dc8   :  { %354 = vrot.lane.b32.xlu1 %v1374_v26, %s1225_s15 }
0x1dcc   :  { %540 = vrot.lane.b32.xlu1 %v1414_v25, %s1225_s15 }
0x1dd0   :  { %726 = vrot.lane.b32.xlu1 %v1453_v31, %s1225_s15 }
0x1dd4   :  { %908 = vrot.lane.b32.xlu1 %v906_v23, %s1225_s15 }
0x1e32   :  { %v989_v12 = vpop.permute.xlu1 %988 }
0x1e33   :  { %v991_v50 = vmul.f32 %v1222_v29, %v989_v12 }
0x1e35   :  { %993 = vrot.lane.b32.xlu0 %v991_v50, %s1229_s19 }
0x1e36   :  { %v150_v51 = vpop.permute.xlu1 %149 }
0x1e37   :  { %153 = vst.msk [vmem:[%s1550_s5] sm:$0x1] %vm152_vm3, %v150_v51 }
0x1e39   :  { %261 = vrot.lane.b32.xlu0 %v1354_v61, %s1225_s15 }
0x1e3a   :  { %v355_v34 = vpop.permute.xlu1 %354 }
0x1e3b   :  { %358 = vst.msk [vmem:[%s1550_s5] sm:$0x4] %vm357_vm4, %v355_v34 }
0x1e3d   :  { %446 = vrot.lane.b32.xlu0 %v1394_v58, %s1225_s15 }
0x1e3e   :  { %v541_v26 = vpop.permute.xlu1 %540 }
0x1e3f   :  { %544 = vst.msk [vmem:[%s1550_s5] sm:$0x10] %vm543_vm5, %v541_v26 }
0x1e41   :  { %632 = vrot.lane.b32.xlu0 %v1434_v59, %s1225_s15 }
0x1e42   :  { %v727_v25 = vpop.permute.xlu1 %726 }
0x1e43   :  { %730 = vst.msk [vmem:[%s1550_s5] sm:$0x40] %vm729_vm6, %v727_v25 }
0x1e45   :  { %818 = vrot.lane.b32.xlu0 %v1472_v57, %s1225_s15 }
0x1e46   :  { %v909_v61 = vpop.permute.xlu1 %908 }
0x1e47   :  { %911 = vst.msk [vmem:[%s1550_s5 + $0x8] sm:$0x1] %vm152_vm3, %v909_v61 }
0x1ea7   :  { %v994_v58 = vpop.permute.xlu0 %993 }
0x1ea8   :  { %v996_v31 = vadd.f32 %v1224_v47, %v994_v58 }
0x1eaa   :  { %998 = vrot.lane.b32.xlu0 %v996_v31, %s1225_s15 }
0x1eab   :  { %v262_v59 = vpop.permute.xlu0 %261 }
0x1eac   :  { %265 = vst.msk [vmem:[%s1550_s5] sm:$0x2] %vm264_vm7, %v262_v59 }
0x1eaf   :  { %v447_v52 = vpop.permute.xlu0 %446 }
0x1eb0   :  { %450 = vst.msk [vmem:[%s1550_s5] sm:$0x8] %vm449_vm8, %v447_v52 }
0x1eb3   :  { %v633_v53 = vpop.permute.xlu0 %632 }
0x1eb4   :  { %636 = vst.msk [vmem:[%s1550_s5] sm:$0x20] %vm635_vm9, %v633_v53 }
0x1eb7   :  { %v819_v54 = vpop.permute.xlu0 %818 }
0x1eb8   :  { %822 = vst.msk [vmem:[%s1550_s5] sm:$0x80] %vm821_vm10, %v819_v54 }
0x1f1c   :  { %v999_v55 = vpop.permute.xlu0 %998 }
0x1f1d   :  { %1001 = vst.msk [vmem:[%s1550_s5 + $0x8] sm:$0x2] %vm264_vm7, %v999_v55 }

</bundles_post_ra>
